<compile_context>
chip_gen: v5e
topology: v5e:2x2
jax: 0.10.0
libtpu: 0.0.40
codegen_flags: <defaults>
</compile_context>

<pallas_src>
import functools

import jax
import jax.numpy as jnp
from jax.experimental import pallas as pl
from jax.experimental.pallas import tpu as pltpu

LEAKY_SLOPE = 0.01   # torch.nn.LeakyReLU default negative_slope
_LANE = 128
_SUBLANE = 8


def _leaky_relu(x):
    return jnp.where(x > 0, x, LEAKY_SLOPE * x)


def _round_up(v, m):
    return ((v + m - 1) // m) * m


# ---------------------------------------------------------------------------
# Fused kernel: all hidden FiLM layers + output layer in one body.
# Ref order: x, dosages, [w, b, wgb, bgb] * n_hidden, w_out, b_out, out
# ---------------------------------------------------------------------------
def _make_fused_kernel(n_hidden, gamma_splits):
    def kernel(*refs):
        x_ref, d_ref = refs[0], refs[1]
        o_ref = refs[-1]

        x = x_ref[...]            # (TB, in_p)  f32
        d = d_ref[...]            # (TB, dos_p) f32

        idx = 2
        for li in range(n_hidden):
            w = refs[idx][...]
            b = refs[idx + 1][...]
            wgb = refs[idx + 2][...]
            bgb = refs[idx + 3][...]
            idx += 4

            # Main path: x @ W + b on the MXU, f32 accumulate.
            h = jnp.dot(x, w, preferred_element_type=jnp.float32) + b

            # FiLM path: one wide matmul produces [gamma | beta].
            gb = _leaky_relu(
                jnp.dot(d, wgb, preferred_element_type=jnp.float32) + bgb)
            split = gamma_splits[li]          # padded d_out -> lane-aligned split
            gamma = gb[:, :split]
            beta = gb[:, split:]

            x = _leaky_relu(gamma * h + beta)

        w_out = refs[idx][...]
        b_out = refs[idx + 1][...]
        y = jnp.dot(x, w_out, preferred_element_type=jnp.float32) + b_out
        o_ref[...] = _leaky_relu(y).astype(o_ref.dtype)

    return kernel


def _fused_forward(x_pad, d_pad, flat_weights, n_hidden, gamma_splits, tb, out_p):
    b_pad = x_pad.shape[0]
    grid = (b_pad // tb,)

    in_specs = [
        pl.BlockSpec((tb, x_pad.shape[1]), lambda i: (i, 0)),   # x: row-tiled
        pl.BlockSpec((tb, d_pad.shape[1]), lambda i: (i, 0)),   # dosages: row-tiled
    ]
    # Weights / biases: full-array blocks, VMEM-resident across all grid steps.
    for warr in flat_weights:
        in_specs.append(pl.BlockSpec(warr.shape, lambda i: (0, 0)))

    kernel = _make_fused_kernel(n_hidden, gamma_splits)

    return pl.pallas_call(
        kernel,
        out_shape=jax.ShapeDtypeStruct((b_pad, out_p), x_pad.dtype),
        grid=grid,
        in_specs=in_specs,
        out_specs=pl.BlockSpec((tb, out_p), lambda i: (i, 0)),
        compiler_params=pltpu.CompilerParams(
            dimension_semantics=("parallel",),       # shard batch over TCs (v7x)
            vmem_limit_bytes=32 * 1024 * 1024,        # safe on v5e/v6e/v7x
        ),
    )(x_pad, d_pad, *flat_weights)


# ---------------------------------------------------------------------------
# Parameter construction (deterministic, mirrors the __init__ shapes)
# ---------------------------------------------------------------------------
def _xavier_uniform(key, fan_in, fan_out):
    bound = (6.0 / (fan_in + fan_out)) ** 0.5
    return jax.random.uniform(key, (fan_in, fan_out), jnp.float32, -bound, bound)


def _bias_uniform(key, fan_in, fan_out):
    bound = 1.0 / (fan_in ** 0.5)
    return jax.random.uniform(key, (1, fan_out), jnp.float32, -bound, bound)


def init_params(key, input_dim, hidden_layers, output_dim, dosage_dim):
    params = {"hidden": []}
    dims = [input_dim] + hidden_layers
    for i in range(len(hidden_layers)):
        key, k1, k2, k3, k4, k5, k6 = jax.random.split(key, 7)
        d_in, d_out = dims[i], dims[i + 1]
        params["hidden"].append(dict(
            w=_xavier_uniform(k1, d_in, d_out),
            b=_bias_uniform(k2, d_in, d_out),
            # FilmGenerator (hidden_layers=[]): gamma/beta are single Linear layers
            wg=_xavier_uniform(k3, dosage_dim, d_out),
            bg=_bias_uniform(k4, dosage_dim, d_out),
            wb=_xavier_uniform(k5, dosage_dim, d_out),
            bb=_bias_uniform(k6, dosage_dim, d_out),
        ))
    key, k1, k2 = jax.random.split(key, 3)
    params["out_w"] = _xavier_uniform(k1, dims[-1], output_dim)
    params["out_b"] = _bias_uniform(k2, dims[-1], output_dim)
    return params


def pack_params(params, dosage_dim):
    """Zero-pad every feature dim to a multiple of 128 and concatenate the
    gamma/beta weights so the kernel does one dosage matmul per layer."""
    dos_p = _round_up(dosage_dim, _LANE)
    packed = {"hidden": []}
    for lp in params["hidden"]:
        d_in, d_out = lp["w"].shape
        d_in_p, d_out_p = _round_up(d_in, _LANE), _round_up(d_out, _LANE)

        w = jnp.zeros((d_in_p, d_out_p), jnp.float32).at[:d_in, :d_out].set(lp["w"])
        b = jnp.zeros((1, d_out_p), jnp.float32).at[:, :d_out].set(lp["b"])

        wgb = jnp.zeros((dos_p, 2 * d_out_p), jnp.float32)
        wgb = wgb.at[:dosage_dim, :d_out].set(lp["wg"])
        wgb = wgb.at[:dosage_dim, d_out_p:d_out_p + d_out].set(lp["wb"])
        bgb = jnp.zeros((1, 2 * d_out_p), jnp.float32)
        bgb = bgb.at[:, :d_out].set(lp["bg"])
        bgb = bgb.at[:, d_out_p:d_out_p + d_out].set(lp["bb"])

        packed["hidden"].append(dict(w=w, b=b, wgb=wgb, bgb=bgb))

    d_in, d_out = params["out_w"].shape
    d_in_p, d_out_p = _round_up(d_in, _LANE), _round_up(d_out, _LANE)
    packed["out_w"] = jnp.zeros((d_in_p, d_out_p), jnp.float32).at[:d_in, :d_out].set(
        params["out_w"])
    packed["out_b"] = jnp.zeros((1, d_out_p), jnp.float32).at[:, :d_out].set(
        params["out_b"])
    return packed


# ---------------------------------------------------------------------------
# Forward pass (padding glue in JAX; all compute in one Pallas kernel)
# ---------------------------------------------------------------------------
@functools.partial(jax.jit, static_argnames=("out_dim",))
def network_block_film_forward(x, dosages, packed, out_dim):
    B, in_dim = x.shape
    dos_dim = dosages.shape[1]
    in_p = _round_up(in_dim, _LANE)
    dos_p = _round_up(dos_dim, _LANE)

    # Large batch tiles (per-step overhead ~0.35us); tiny batches use one tile.
    tb = _round_up(B, _SUBLANE) if B <= 1024 else 1024
    b_pad = _round_up(B, tb)

    x_pad = jnp.zeros((b_pad, in_p), jnp.float32).at[:B, :in_dim].set(x)
    d_pad = jnp.zeros((b_pad, dos_p), jnp.float32).at[:B, :dos_dim].set(dosages)

    flat, gamma_splits = [], []
    for lp in packed["hidden"]:
        flat.extend([lp["w"], lp["b"], lp["wgb"], lp["bgb"]])
        gamma_splits.append(lp["w"].shape[1])        # padded d_out (static)
    flat.extend([packed["out_w"], packed["out_b"]])
    out_p = packed["out_w"].shape[1]

    y_pad = _fused_forward(x_pad, d_pad, flat, len(packed["hidden"]),
                           tuple(gamma_splits), tb, out_p)
    return y_pad[:B, :out_dim]


def reference_forward(x, dosages, params):
    for lp in params["hidden"]:
        h = x @ lp["w"] + lp["b"]
        gamma = _leaky_relu(dosages @ lp["wg"] + lp["bg"])
        beta = _leaky_relu(dosages @ lp["wb"] + lp["bb"])
        x = _leaky_relu(gamma * h + beta)
    return _leaky_relu(x @ params["out_w"] + params["out_b"])


if __name__ == "__main__":
    # Shapes consistent with the module:
    #   NetworkBlockFilm(input_dim=32, hidden_layers=[64, 32], output_dim=16)
    #   FilmLayerFactory(input_dim=4, hidden_layers=[])
    B, INPUT_DIM, HIDDEN, OUTPUT_DIM, DOSAGE_DIM = 8, 32, [64, 32], 16, 4

    key = jax.random.PRNGKey(0)
    kp, kx, kd = jax.random.split(key, 3)
    params = init_params(kp, INPUT_DIM, HIDDEN, OUTPUT_DIM, DOSAGE_DIM)
    packed = pack_params(params, DOSAGE_DIM)

    x = jax.random.normal(kx, (B, INPUT_DIM), jnp.float32)
    dosages = jax.random.uniform(kd, (B, DOSAGE_DIM), jnp.float32)

    out = network_block_film_forward(x, dosages, packed, OUTPUT_DIM)
    out = jax.block_until_ready(out)

    ref = reference_forward(x, dosages, params)
    assert out.shape == (B, OUTPUT_DIM)
    assert jnp.allclose(out, ref, atol=1e-5, rtol=1e-5), "mismatch vs. JAX reference"

    print("KERNEL_OK")
</pallas_src>

<mosaic_0001>
module attributes {stable_mosaic.version = 11 : i64} {
  func.func @kernel(%arg0: i32, %arg1: memref<8x128xf32, #tpu.memory_space<vmem>>, %arg2: memref<8x128xf32, #tpu.memory_space<vmem>>, %arg3: memref<128x128xf32, #tpu.memory_space<vmem>>, %arg4: memref<1x128xf32, #tpu.memory_space<vmem>>, %arg5: memref<128x256xf32, #tpu.memory_space<vmem>>, %arg6: memref<1x256xf32, #tpu.memory_space<vmem>>, %arg7: memref<128x128xf32, #tpu.memory_space<vmem>>, %arg8: memref<1x128xf32, #tpu.memory_space<vmem>>, %arg9: memref<128x256xf32, #tpu.memory_space<vmem>>, %arg10: memref<1x256xf32, #tpu.memory_space<vmem>>, %arg11: memref<128x128xf32, #tpu.memory_space<vmem>>, %arg12: memref<1x128xf32, #tpu.memory_space<vmem>>, %arg13: memref<8x128xf32, #tpu.memory_space<vmem>>) attributes {dimension_semantics = [#tpu.dimension_semantics<parallel>], iteration_bounds = array<i64: 1>, scalar_prefetch = 0 : i64, scratch_operands = 0 : i64, tpu.core_type = #tpu.core_type<tc>, window_params = [{transform_indices = @transform_0, window_bounds = array<i64: 8, 128>}, {transform_indices = @transform_1, window_bounds = array<i64: 8, 128>}, {pipeline_mode = #tpu.pipeline_mode<synchronous>, transform_indices = @transform_2, window_bounds = array<i64: 128, 128>}, {pipeline_mode = #tpu.pipeline_mode<synchronous>, transform_indices = @transform_3, window_bounds = array<i64: 1, 128>}, {pipeline_mode = #tpu.pipeline_mode<synchronous>, transform_indices = @transform_4, window_bounds = array<i64: 128, 256>}, {pipeline_mode = #tpu.pipeline_mode<synchronous>, transform_indices = @transform_5, window_bounds = array<i64: 1, 256>}, {pipeline_mode = #tpu.pipeline_mode<synchronous>, transform_indices = @transform_6, window_bounds = array<i64: 128, 128>}, {pipeline_mode = #tpu.pipeline_mode<synchronous>, transform_indices = @transform_7, window_bounds = array<i64: 1, 128>}, {pipeline_mode = #tpu.pipeline_mode<synchronous>, transform_indices = @transform_8, window_bounds = array<i64: 128, 256>}, {pipeline_mode = #tpu.pipeline_mode<synchronous>, transform_indices = @transform_9, window_bounds = array<i64: 1, 256>}, {pipeline_mode = #tpu.pipeline_mode<synchronous>, transform_indices = @transform_10, window_bounds = array<i64: 128, 128>}, {pipeline_mode = #tpu.pipeline_mode<synchronous>, transform_indices = @transform_11, window_bounds = array<i64: 1, 128>}, {transform_indices = @transform_12, window_bounds = array<i64: 8, 128>}]} {
    %c0 = arith.constant 0 : index
    %c0_0 = arith.constant 0 : index
    %0 = vector.load %arg1[%c0, %c0_0] : memref<8x128xf32, #tpu.memory_space<vmem>>, vector<8x128xf32>
    %c0_1 = arith.constant 0 : index
    %c0_2 = arith.constant 0 : index
    %1 = vector.load %arg2[%c0_1, %c0_2] : memref<8x128xf32, #tpu.memory_space<vmem>>, vector<8x128xf32>
    %c0_3 = arith.constant 0 : index
    %c0_4 = arith.constant 0 : index
    %2 = vector.load %arg3[%c0_3, %c0_4] : memref<128x128xf32, #tpu.memory_space<vmem>>, vector<128x128xf32>
    %c0_5 = arith.constant 0 : index
    %c0_6 = arith.constant 0 : index
    %3 = vector.load %arg4[%c0_5, %c0_6] : memref<1x128xf32, #tpu.memory_space<vmem>>, vector<1x128xf32>
    %c0_7 = arith.constant 0 : index
    %c0_8 = arith.constant 0 : index
    %4 = vector.load %arg5[%c0_7, %c0_8] : memref<128x256xf32, #tpu.memory_space<vmem>>, vector<128x256xf32>
    %c0_9 = arith.constant 0 : index
    %c0_10 = arith.constant 0 : index
    %5 = vector.load %arg6[%c0_9, %c0_10] : memref<1x256xf32, #tpu.memory_space<vmem>>, vector<1x256xf32>
    %cst = arith.constant dense<0.000000e+00> : vector<8x128xf32>
    %6 = tpu.matmul %0, %2, %cst {dimension_numbers = #tpu.dot_dimension_numbers<[1], [0], [0], [1], [0, 0, 1, 1], [], []>} : vector<8x128xf32>, vector<128x128xf32>, vector<8x128xf32> -> vector<8x128xf32>
    %7 = vector.broadcast %3 : vector<1x128xf32> to vector<8x128xf32>
    %8 = arith.addf %6, %7 : vector<8x128xf32>
    %cst_11 = arith.constant dense<0.000000e+00> : vector<8x256xf32>
    %9 = tpu.matmul %1, %4, %cst_11 {dimension_numbers = #tpu.dot_dimension_numbers<[1], [0], [0], [1], [0, 0, 1, 1], [], []>} : vector<8x128xf32>, vector<128x256xf32>, vector<8x256xf32> -> vector<8x256xf32>
    %10 = vector.broadcast %5 : vector<1x256xf32> to vector<8x256xf32>
    %11 = arith.addf %9, %10 : vector<8x256xf32>
    %cst_12 = arith.constant 0.000000e+00 : f32
    %12 = vector.broadcast %cst_12 : f32 to vector<8x256xf32>
    %13 = arith.cmpf ogt, %11, %12 : vector<8x256xf32>
    %cst_13 = arith.constant 0.00999999977 : f32
    %14 = vector.broadcast %cst_13 : f32 to vector<8x256xf32>
    %15 = arith.mulf %14, %11 : vector<8x256xf32>
    %16 = arith.select %13, %11, %15 : vector<8x256xi1>, vector<8x256xf32>
    %17 = vector.extract_strided_slice %16 {offsets = [0, 0], sizes = [8, 128], strides = [1, 1]} : vector<8x256xf32> to vector<8x128xf32>
    %18 = vector.extract_strided_slice %16 {offsets = [0, 128], sizes = [8, 128], strides = [1, 1]} : vector<8x256xf32> to vector<8x128xf32>
    %19 = arith.mulf %17, %8 : vector<8x128xf32>
    %20 = arith.addf %19, %18 : vector<8x128xf32>
    %cst_14 = arith.constant 0.000000e+00 : f32
    %21 = vector.broadcast %cst_14 : f32 to vector<8x128xf32>
    %22 = arith.cmpf ogt, %20, %21 : vector<8x128xf32>
    %cst_15 = arith.constant 0.00999999977 : f32
    %23 = vector.broadcast %cst_15 : f32 to vector<8x128xf32>
    %24 = arith.mulf %23, %20 : vector<8x128xf32>
    %25 = arith.select %22, %20, %24 : vector<8x128xi1>, vector<8x128xf32>
    %c0_16 = arith.constant 0 : index
    %c0_17 = arith.constant 0 : index
    %26 = vector.load %arg7[%c0_16, %c0_17] : memref<128x128xf32, #tpu.memory_space<vmem>>, vector<128x128xf32>
    %c0_18 = arith.constant 0 : index
    %c0_19 = arith.constant 0 : index
    %27 = vector.load %arg8[%c0_18, %c0_19] : memref<1x128xf32, #tpu.memory_space<vmem>>, vector<1x128xf32>
    %c0_20 = arith.constant 0 : index
    %c0_21 = arith.constant 0 : index
    %28 = vector.load %arg9[%c0_20, %c0_21] : memref<128x256xf32, #tpu.memory_space<vmem>>, vector<128x256xf32>
    %c0_22 = arith.constant 0 : index
    %c0_23 = arith.constant 0 : index
    %29 = vector.load %arg10[%c0_22, %c0_23] : memref<1x256xf32, #tpu.memory_space<vmem>>, vector<1x256xf32>
    %cst_24 = arith.constant dense<0.000000e+00> : vector<8x128xf32>
    %30 = tpu.matmul %25, %26, %cst_24 {dimension_numbers = #tpu.dot_dimension_numbers<[1], [0], [0], [1], [0, 0, 1, 1], [], []>} : vector<8x128xf32>, vector<128x128xf32>, vector<8x128xf32> -> vector<8x128xf32>
    %31 = vector.broadcast %27 : vector<1x128xf32> to vector<8x128xf32>
    %32 = arith.addf %30, %31 : vector<8x128xf32>
    %cst_25 = arith.constant dense<0.000000e+00> : vector<8x256xf32>
    %33 = tpu.matmul %1, %28, %cst_25 {dimension_numbers = #tpu.dot_dimension_numbers<[1], [0], [0], [1], [0, 0, 1, 1], [], []>} : vector<8x128xf32>, vector<128x256xf32>, vector<8x256xf32> -> vector<8x256xf32>
    %34 = vector.broadcast %29 : vector<1x256xf32> to vector<8x256xf32>
    %35 = arith.addf %33, %34 : vector<8x256xf32>
    %cst_26 = arith.constant 0.000000e+00 : f32
    %36 = vector.broadcast %cst_26 : f32 to vector<8x256xf32>
    %37 = arith.cmpf ogt, %35, %36 : vector<8x256xf32>
    %cst_27 = arith.constant 0.00999999977 : f32
    %38 = vector.broadcast %cst_27 : f32 to vector<8x256xf32>
    %39 = arith.mulf %38, %35 : vector<8x256xf32>
    %40 = arith.select %37, %35, %39 : vector<8x256xi1>, vector<8x256xf32>
    %41 = vector.extract_strided_slice %40 {offsets = [0, 0], sizes = [8, 128], strides = [1, 1]} : vector<8x256xf32> to vector<8x128xf32>
    %42 = vector.extract_strided_slice %40 {offsets = [0, 128], sizes = [8, 128], strides = [1, 1]} : vector<8x256xf32> to vector<8x128xf32>
    %43 = arith.mulf %41, %32 : vector<8x128xf32>
    %44 = arith.addf %43, %42 : vector<8x128xf32>
    %cst_28 = arith.constant 0.000000e+00 : f32
    %45 = vector.broadcast %cst_28 : f32 to vector<8x128xf32>
    %46 = arith.cmpf ogt, %44, %45 : vector<8x128xf32>
    %cst_29 = arith.constant 0.00999999977 : f32
    %47 = vector.broadcast %cst_29 : f32 to vector<8x128xf32>
    %48 = arith.mulf %47, %44 : vector<8x128xf32>
    %49 = arith.select %46, %44, %48 : vector<8x128xi1>, vector<8x128xf32>
    %c0_30 = arith.constant 0 : index
    %c0_31 = arith.constant 0 : index
    %50 = vector.load %arg11[%c0_30, %c0_31] : memref<128x128xf32, #tpu.memory_space<vmem>>, vector<128x128xf32>
    %c0_32 = arith.constant 0 : index
    %c0_33 = arith.constant 0 : index
    %51 = vector.load %arg12[%c0_32, %c0_33] : memref<1x128xf32, #tpu.memory_space<vmem>>, vector<1x128xf32>
    %cst_34 = arith.constant dense<0.000000e+00> : vector<8x128xf32>
    %52 = tpu.matmul %49, %50, %cst_34 {dimension_numbers = #tpu.dot_dimension_numbers<[1], [0], [0], [1], [0, 0, 1, 1], [], []>} : vector<8x128xf32>, vector<128x128xf32>, vector<8x128xf32> -> vector<8x128xf32>
    %53 = vector.broadcast %51 : vector<1x128xf32> to vector<8x128xf32>
    %54 = arith.addf %52, %53 : vector<8x128xf32>
    %cst_35 = arith.constant 0.000000e+00 : f32
    %55 = vector.broadcast %cst_35 : f32 to vector<8x128xf32>
    %56 = arith.cmpf ogt, %54, %55 : vector<8x128xf32>
    %cst_36 = arith.constant 0.00999999977 : f32
    %57 = vector.broadcast %cst_36 : f32 to vector<8x128xf32>
    %58 = arith.mulf %57, %54 : vector<8x128xf32>
    %59 = arith.select %56, %54, %58 : vector<8x128xi1>, vector<8x128xf32>
    %c0_37 = arith.constant 0 : index
    %c0_38 = arith.constant 0 : index
    %60 = vector.load %arg13[%c0_37, %c0_38] : memref<8x128xf32, #tpu.memory_space<vmem>>, vector<8x128xf32>
    tpu.vector_store %arg13[%c0_37, %c0_38], %59 {strides = array<i32>} : memref<8x128xf32, #tpu.memory_space<vmem>>, vector<8x128xf32>,
    return
  }
  func.func @transform_0(%arg0: i32) -> (i32, i32) {
    %c0_i32 = arith.constant 0 : i32
    %c0_i32_0 = arith.constant 0 : i32
    return %arg0, %c0_i32 : i32, i32
  }
  func.func @transform_1(%arg0: i32) -> (i32, i32) {
    %c0_i32 = arith.constant 0 : i32
    %c0_i32_0 = arith.constant 0 : i32
    return %arg0, %c0_i32 : i32, i32
  }
  func.func @transform_2(%arg0: i32) -> (i32, i32) {
    %c0_i32 = arith.constant 0 : i32
    %c0_i32_0 = arith.constant 0 : i32
    %c0_i32_1 = arith.constant 0 : i32
    return %c0_i32, %c0_i32_0 : i32, i32
  }
  func.func @transform_3(%arg0: i32) -> (i32, i32) {
    %c0_i32 = arith.constant 0 : i32
    %c0_i32_0 = arith.constant 0 : i32
    %c0_i32_1 = arith.constant 0 : i32
    return %c0_i32, %c0_i32_0 : i32, i32
  }
  func.func @transform_4(%arg0: i32) -> (i32, i32) {
    %c0_i32 = arith.constant 0 : i32
    %c0_i32_0 = arith.constant 0 : i32
    %c0_i32_1 = arith.constant 0 : i32
    return %c0_i32, %c0_i32_0 : i32, i32
  }
  func.func @transform_5(%arg0: i32) -> (i32, i32) {
    %c0_i32 = arith.constant 0 : i32
    %c0_i32_0 = arith.constant 0 : i32
    %c0_i32_1 = arith.constant 0 : i32
    return %c0_i32, %c0_i32_0 : i32, i32
  }
  func.func @transform_6(%arg0: i32) -> (i32, i32) {
    %c0_i32 = arith.constant 0 : i32
    %c0_i32_0 = arith.constant 0 : i32
    %c0_i32_1 = arith.constant 0 : i32
    return %c0_i32, %c0_i32_0 : i32, i32
  }
  func.func @transform_7(%arg0: i32) -> (i32, i32) {
    %c0_i32 = arith.constant 0 : i32
    %c0_i32_0 = arith.constant 0 : i32
    %c0_i32_1 = arith.constant 0 : i32
    return %c0_i32, %c0_i32_0 : i32, i32
  }
  func.func @transform_8(%arg0: i32) -> (i32, i32) {
    %c0_i32 = arith.constant 0 : i32
    %c0_i32_0 = arith.constant 0 : i32
    %c0_i32_1 = arith.constant 0 : i32
    return %c0_i32, %c0_i32_0 : i32, i32
  }
  func.func @transform_9(%arg0: i32) -> (i32, i32) {
    %c0_i32 = arith.constant 0 : i32
    %c0_i32_0 = arith.constant 0 : i32
    %c0_i32_1 = arith.constant 0 : i32
    return %c0_i32, %c0_i32_0 : i32, i32
  }
  func.func @transform_10(%arg0: i32) -> (i32, i32) {
    %c0_i32 = arith.constant 0 : i32
    %c0_i32_0 = arith.constant 0 : i32
    %c0_i32_1 = arith.constant 0 : i32
    return %c0_i32, %c0_i32_0 : i32, i32
  }
  func.func @transform_11(%arg0: i32) -> (i32, i32) {
    %c0_i32 = arith.constant 0 : i32
    %c0_i32_0 = arith.constant 0 : i32
    %c0_i32_1 = arith.constant 0 : i32
    return %c0_i32, %c0_i32_0 : i32, i32
  }
  func.func @transform_12(%arg0: i32) -> (i32, i32) {
    %c0_i32 = arith.constant 0 : i32
    %c0_i32_0 = arith.constant 0 : i32
    return %arg0, %c0_i32 : i32, i32
  }
}

</mosaic_0001>

<bundles_post_ra>
// kernel: network_block_film_forward.1
= control target key start
LH: loop header
LB: loop body
LE: loop exit
PB: predicated region body
PF: predicated region fallthrough
CT: control target
= control target key end

     0   :  { %17 = vsyncpa [#allocation3], 0  ;;  %s728_s0 = inlined_call_operand.vmem [shape: f32[8,128], index: 0, kind: input, shape index: {}]   ;;  %s729_s1 = inlined_call_operand.vmem [shape: f32[8,128], index: 1, kind: input, shape index: {}]   ;;  %s730_s2 = inlined_call_operand.hbm [shape: f32[128,128], index: 2, kind: input, shape index: {}]   ;;  %s731_s3 = inlined_call_operand.vmem [shape: f32[1,128], index: 3, kind: input, shape index: {}]   ;;  %s732_s4 = inlined_call_operand.hbm [shape: f32[128,256], index: 4, kind: input, shape index: {}]   ;;  %s733_s5 = inlined_call_operand.vmem [shape: f32[1,256], index: 5, kind: input, shape index: {}]   ;;  %s734_s6 = inlined_call_operand.hbm [shape: f32[128,128], index: 6, kind: input, shape index: {}]   ;;  %s735_s7 = inlined_call_operand.vmem [shape: f32[1,128], index: 7, kind: input, shape index: {}]   ;;  %s736_s8 = inlined_call_operand.hbm [shape: f32[128,256], index: 8, kind: input, shape index: {}]   ;;  %s737_s9 = inlined_call_operand.vmem [shape: f32[1,256], index: 9, kind: input, shape index: {}]   ;;  %s738_s10 = inlined_call_operand.hbm [shape: f32[128,128], index: 10, kind: input, shape index: {}]   ;;  %s739_s11 = inlined_call_operand.vmem [shape: f32[1,128], index: 11, kind: input, shape index: {}]   ;;  %s740_s12 = inlined_call_operand.hbm [shape: f32[8,128], index: 12, kind: output, shape index: {}]  }
   0x1   :  { %18 = vsyncpa [#allocation6], 0 }
   0x2   :  { %19 = vsyncpa [#allocation9], 0  ;;  %s44_s23 = sshll.u32 %s732_s4, 4  ;;  %s45_s23 = int_to_ptr.hbm [resolvable:$true] %s44_s23 }
   0x3   :  { %20 = vsyncpa [#allocation4], 0  ;;  %s608_s24 = smov [#allocation5]   ;;  %s74_s28 = sshll.u32 %s736_s8, 4  ;;  %s75_s28 = int_to_ptr.hbm [resolvable:$true] %s74_s28 }
   0x4   :  { %s46_s25 = sshll.u32 %s608_s24, 4  ;;  %s609_s29 = smov 256   ;;  %s47_s25 = int_to_ptr.vmem [resolvable:$true] %s46_s25 }
   0x5   :  { %s610_s30 = smov 16   ;;  %s611_s13 = smov [#allocation8]  }
   0x6   :  { %52 = dma.hbm_to_vmem [thread:$0]  %s45_s23, 4096, %s47_s25, [#allocation6], %s609_s29, %s609_s29, %s610_s30  }
   0x7   :  { %s76_s14 = sshll.u32 %s611_s13, 4  ;;  %s29_s17 = sshll.u32 %s730_s2, 4  ;;  %s77_s14 = int_to_ptr.vmem [resolvable:$true] %s76_s14  ;;  %s30_s17 = int_to_ptr.hbm [resolvable:$true] %s29_s17 }
   0x8   :  { %82 = dma.hbm_to_vmem [thread:$0]  %s75_s28, 4096, %s77_s14, [#allocation9], %s609_s29, %s609_s29, %s610_s30  }
   0x9   :  { %s612_s4 = smov [#allocation2]   ;;  %s59_s8 = sshll.u32 %s734_s6, 4  ;;  %s60_s8 = int_to_ptr.hbm [resolvable:$true] %s59_s8 }
   0xa   :  { %s31_s18 = sshll.u32 %s612_s4, 4  ;;  %s613_s21 = smov 128   ;;  %s32_s18 = int_to_ptr.vmem [resolvable:$true] %s31_s18 }
   0xb   :  { %s614_s22 = smov 8   ;;  %s615_s23 = smov [#allocation7]  }
   0xc   :  { %37 = dma.hbm_to_vmem [thread:$0]  %s30_s17, 2048, %s32_s18, [#allocation3], %s613_s21, %s613_s21, %s614_s22  }
   0xd   :  { %s61_s24 = sshll.u32 %s615_s23, 4  ;;  %s89_s2 = sshll.u32 %s738_s10, 4  ;;  %s62_s24 = int_to_ptr.vmem [resolvable:$true] %s61_s24  ;;  %s90_s2 = int_to_ptr.hbm [resolvable:$true] %s89_s2 }
   0xe   :  { %67 = dma.hbm_to_vmem [thread:$0]  %s60_s8, 2048, %s62_s24, [#allocation6], %s613_s21, %s613_s21, %s614_s22  }
   0xf   :  { %s616_s27 = smov [#allocation10]  }
  0x10   :  { %s91_s28 = sshll.u32 %s616_s27, 4  ;;  %s92_s28 = int_to_ptr.vmem [resolvable:$true] %s91_s28 }
  0x11   :  { %97 = dma.hbm_to_vmem [thread:$0]  %s90_s2, 2048, %s92_s28, [#allocation9], %s613_s21, %s613_s21, %s614_s22  }
  0x12   :  { %600 = dma.done.wait [#allocation3], 2048  }
  0x13   :  { %601 = vsyncadd [#allocation3], 4294965248 }
  0x14   :  { %602 = dma.done.wait [#allocation6], 6144  }
  0x15   :  { %603 = vsyncadd [#allocation6], 4294961152 }
  0x16   :  { %604 = dma.done.wait [#allocation9], 6144  }
  0x17   :  { %605 = vsyncadd [#allocation9], 4294961152  ;;  %v170_v0 = vld [vmem:[#allocation5 + $0xf8] sm:$0xff]  ;;  %v169_v1 = vld [vmem:[#allocation5 + $0xf0] sm:$0xff]  ;;  %s431_s20 = sshll.u32 %s740_s12, 4  ;;  %s432_s20 = int_to_ptr.hbm [resolvable:$true] %s431_s20 }
  0x18   :  { %v168_v2 = vld [vmem:[#allocation5 + $0xe8] sm:$0xff]  ;;  %220 = vmatpush.msra.mxu2 %v170_v0  ;;  %200 = vmatpush.msra.mxu1 %v169_v1  ;;  %v167_v3 = vld [vmem:[#allocation5 + $0xe0] sm:$0xff]  ;;  %v137_v4 = vld [vmem:[#allocation2 + $0x78] sm:$0xff] }
  0x19   :  { %v166_v5 = vld [vmem:[#allocation5 + $0xd8] sm:$0xff]  ;;  %175 = vmatpush.msra.mxu0 %v137_v4  ;;  %v165_v6 = vld [vmem:[#allocation5 + $0xd0] sm:$0xff]  ;;  %v135_v8 = vld [vmem:[#allocation2 + $0x68] sm:$0xff] }
  0x1a   :  { %v136_v7 = vld [vmem:[#allocation2 + $0x70] sm:$0xff]  ;;  %221 = vmatpush.msra.mxu2 %v168_v2  ;;  %201 = vmatpush.msra.mxu1 %v167_v3  ;;  %v164_v9 = vld [vmem:[#allocation5 + $0xc8] sm:$0xff]  ;;  %v163_v10 = vld [vmem:[#allocation5 + $0xc0] sm:$0xff] }
  0x1b   :  { %176 = vmatpush.msra.mxu0 %v136_v7  ;;  %v134_v11 = vld [vmem:[#allocation2 + $0x60] sm:$0xff]  ;;  %v162_v12 = vld [vmem:[#allocation5 + $0xb8] sm:$0xff]  ;;  %v161_v13 = vld [vmem:[#allocation5 + $0xb0] sm:$0xff] }
  0x1c   :  { %222 = vmatpush.msra.mxu2 %v166_v5  ;;  %202 = vmatpush.msra.mxu1 %v165_v6  ;;  %v133_v14 = vld [vmem:[#allocation2 + $0x58] sm:$0xff]  ;;  %v160_v15 = vld [vmem:[#allocation5 + $0xa8] sm:$0xff]  ;;  %v159_v16 = vld [vmem:[#allocation5 + $0xa0] sm:$0xff] }
  0x1d   :  { %177 = vmatpush.msra.mxu0 %v135_v8  ;;  %v132_v17 = vld [vmem:[#allocation2 + $0x50] sm:$0xff]  ;;  %v158_v18 = vld [vmem:[#allocation5 + $0x98] sm:$0xff]  ;;  %v131_v20 = vld [vmem:[#allocation2 + $0x48] sm:$0xff] }
  0x1e   :  { %223 = vmatpush.msra.mxu2 %v164_v9  ;;  %203 = vmatpush.msra.mxu1 %v163_v10  ;;  %v157_v19 = vld [vmem:[#allocation5 + $0x90] sm:$0xff]  ;;  %v156_v21 = vld [vmem:[#allocation5 + $0x88] sm:$0xff]  ;;  %v155_v22 = vld [vmem:[#allocation5 + $0x80] sm:$0xff] }
  0x1f   :  { %178 = vmatpush.msra.mxu0 %v134_v11  ;;  %v130_v23 = vld [vmem:[#allocation2 + $0x40] sm:$0xff]  ;;  %v154_v24 = vld [vmem:[#allocation5 + $0x78] sm:$0xff]  ;;  %v153_v25 = vld [vmem:[#allocation5 + $0x70] sm:$0xff] }
  0x20   :  { %224 = vmatpush.msra.mxu2 %v162_v12  ;;  %204 = vmatpush.msra.mxu1 %v161_v13  ;;  %v129_v26 = vld [vmem:[#allocation2 + $0x38] sm:$0xff]  ;;  %v152_v27 = vld [vmem:[#allocation5 + $0x68] sm:$0xff]  ;;  %v151_v28 = vld [vmem:[#allocation5 + $0x60] sm:$0xff] }
  0x21   :  { %179 = vmatpush.msra.mxu0 %v133_v14  ;;  %v266_v29 = vld [vmem:[#allocation7 + $0x78] sm:$0xff]  ;;  %v128_v30 = vld [vmem:[#allocation2 + $0x30] sm:$0xff]  ;;  %v127_v34 = vld [vmem:[#allocation2 + $0x28] sm:$0xff] }
  0x22   :  { %225 = vmatpush.msra.mxu2 %v160_v15  ;;  %205 = vmatpush.msra.mxu1 %v159_v16  ;;  %v265_v31 = vld [vmem:[#allocation7 + $0x70] sm:$0xff]  ;;  %v150_v32 = vld [vmem:[#allocation5 + $0x58] sm:$0xff]  ;;  %v264_v35 = vld [vmem:[#allocation7 + $0x68] sm:$0xff] }
  0x23   :  { %180 = vmatpush.msra.mxu0 %v132_v17  ;;  %v149_v33 = vld [vmem:[#allocation5 + $0x50] sm:$0xff]  ;;  %304 = vmatpush.msra.mxu3 %v266_v29  ;;  %v148_v36 = vld [vmem:[#allocation5 + $0x48] sm:$0xff]  ;;  %v147_v37 = vld [vmem:[#allocation5 + $0x40] sm:$0xff] }
  0x24   :  { %226 = vmatpush.msra.mxu2 %v158_v18  ;;  %206 = vmatpush.msra.mxu1 %v157_v19  ;;  %v126_v38 = vld [vmem:[#allocation2 + $0x20] sm:$0xff]  ;;  %v146_v40 = vld [vmem:[#allocation5 + $0x38] sm:$0xff]  ;;  %v145_v41 = vld [vmem:[#allocation5 + $0x30] sm:$0xff] }
  0x25   :  { %181 = vmatpush.msra.mxu0 %v131_v20  ;;  %305 = vmatpush.msra.mxu3 %v265_v31  ;;  %v263_v39 = vld [vmem:[#allocation7 + $0x60] sm:$0xff]  ;;  %v144_v42 = vld [vmem:[#allocation5 + $0x28] sm:$0xff]  ;;  %v125_v43 = vld [vmem:[#allocation2 + $0x18] sm:$0xff] }
  0x26   :  { %227 = vmatpush.msra.mxu2 %v156_v21  ;;  %207 = vmatpush.msra.mxu1 %v155_v22  ;;  %v262_v44 = vld [vmem:[#allocation7 + $0x58] sm:$0xff]  ;;  %v143_v45 = vld [vmem:[#allocation5 + $0x20] sm:$0xff]  ;;  %v124_v46 = vld [vmem:[#allocation2 + $0x10] sm:$0xff] }
  0x27   :  { %182 = vmatpush.msra.mxu0 %v130_v23  ;;  %306 = vmatpush.msra.mxu3 %v264_v35  ;;  %v261_v47 = vld [vmem:[#allocation7 + $0x50] sm:$0xff]  ;;  %v142_v48 = vld [vmem:[#allocation5 + $0x18] sm:$0xff]  ;;  %v123_v50 = vld [vmem:[#allocation2 + $0x8] sm:$0xff] }
  0x28   :  { %228 = vmatpush.msra.mxu2 %v154_v24  ;;  %208 = vmatpush.msra.mxu1 %v153_v25  ;;  %v141_v49 = vld [vmem:[#allocation5 + $0x10] sm:$0xff]  ;;  %v260_v51 = vld [vmem:[#allocation7 + $0x48] sm:$0xff]  ;;  %v139_v53 = vld [vmem:[#allocation5] sm:$0xff] }
  0x29   :  { %183 = vmatpush.msra.mxu0 %v129_v26  ;;  %307 = vmatpush.msra.mxu3 %v263_v39  ;;  %v140_v52 = vld [vmem:[#allocation5 + $0x8] sm:$0xff]  ;;  %v701_v54 = vld [vmem:[%s729_s1] sm:$0xff]  ;;  %v299_v56 = vld [vmem:[#allocation8 + $0xf8] sm:$0xff] }
  0x2a   :  { %229 = vmatpush.msra.mxu2 %v152_v27  ;;  %209 = vmatpush.msra.mxu1 %v151_v28  ;;  %v122_v55 = vld [vmem:[#allocation2] sm:$0xff]  ;;  %v298_v59 = vld [vmem:[#allocation8 + $0xf0] sm:$0xff]  ;;  %v297_v60 = vld [vmem:[#allocation8 + $0xe8] sm:$0xff] }
  0x2b   :  { %184 = vmatpush.msra.mxu0 %v128_v30  ;;  %308 = vmatpush.msra.mxu3 %v262_v44  ;;  %v120_v57 = vld [vmem:[%s728_s0] sm:$0xff]  ;;  %v295_v62 = vld [vmem:[#allocation8 + $0xd8] sm:$0xff]  ;;  %v294_v63 = vld [vmem:[#allocation8 + $0xd0] sm:$0xff] }
  0x2c   :  { %230 = vmatpush.msra.mxu2 %v150_v32  ;;  %210 = vmatpush.msra.mxu1 %v149_v33  ;;  %v259_v58 = vld [vmem:[#allocation7 + $0x40] sm:$0xff]  ;;  %v293_v0 = vld [vmem:[#allocation8 + $0xc8] sm:$0xff]  ;;  %v291_v2 = vld [vmem:[#allocation8 + $0xb8] sm:$0xff] }
  0x2d   :  { %185 = vmatpush.msra.mxu0 %v127_v34  ;;  %309 = vmatpush.msra.mxu3 %v261_v47  ;;  %v296_v61 = vld [vmem:[#allocation8 + $0xe0] sm:$0xff]  ;;  %v290_v3 = vld [vmem:[#allocation8 + $0xb0] sm:$0xff]  ;;  %v289_v4 = vld [vmem:[#allocation8 + $0xa8] sm:$0xff] }
  0x2e   :  { %231 = vmatpush.msra.mxu2 %v148_v36  ;;  %211 = vmatpush.msra.mxu1 %v147_v37  ;;  %v292_v1 = vld [vmem:[#allocation8 + $0xc0] sm:$0xff]  ;;  %v287_v6 = vld [vmem:[#allocation8 + $0x98] sm:$0xff]  ;;  %v286_v7 = vld [vmem:[#allocation8 + $0x90] sm:$0xff] }
  0x2f   :  { %186 = vmatpush.msra.mxu0 %v126_v38  ;;  %310 = vmatpush.msra.mxu3 %v260_v51  ;;  %v288_v5 = vld [vmem:[#allocation8 + $0xa0] sm:$0xff]  ;;  %v258_v9 = vld [vmem:[#allocation7 + $0x38] sm:$0xff]  ;;  %v282_v10 = vld [vmem:[#allocation8 + $0x70] sm:$0xff] }
  0x30   :  { %232 = vmatpush.msra.mxu2 %v146_v40  ;;  %212 = vmatpush.msra.mxu1 %v145_v41  ;;  %v284_v8 = vld [vmem:[#allocation8 + $0x80] sm:$0xff]  ;;  %v285_v11 = vld [vmem:[#allocation8 + $0x88] sm:$0xff]  ;;  %v257_v12 = vld [vmem:[#allocation7 + $0x30] sm:$0xff] }
  0x31   :  { %187 = vmatpush.msra.mxu0 %v125_v43  ;;  %311 = vmatpush.msra.mxu3 %v259_v58  ;;  %v280_v13 = vld [vmem:[#allocation8 + $0x60] sm:$0xff]  ;;  %v283_v14 = vld [vmem:[#allocation8 + $0x78] sm:$0xff]  ;;  %v256_v15 = vld [vmem:[#allocation7 + $0x28] sm:$0xff] }
  0x32   :  { %233 = vmatpush.msra.mxu2 %v144_v42  ;;  %213 = vmatpush.msra.mxu1 %v143_v45  ;;  %v278_v16 = vld [vmem:[#allocation8 + $0x50] sm:$0xff]  ;;  %v281_v17 = vld [vmem:[#allocation8 + $0x68] sm:$0xff]  ;;  %v255_v18 = vld [vmem:[#allocation7 + $0x20] sm:$0xff] }
  0x33   :  { %188 = vmatpush.msra.mxu0 %v124_v46  ;;  %312 = vmatpush.msra.mxu3 %v258_v9  ;;  %v276_v19 = vld [vmem:[#allocation8 + $0x40] sm:$0xff]  ;;  %v279_v20 = vld [vmem:[#allocation8 + $0x58] sm:$0xff]  ;;  %v274_v22 = vld [vmem:[#allocation8 + $0x30] sm:$0xff] }
  0x34   :  { %234 = vmatpush.msra.mxu2 %v142_v48  ;;  %214 = vmatpush.msra.mxu1 %v141_v49  ;;  %v254_v21 = vld [vmem:[#allocation7 + $0x18] sm:$0xff]  ;;  %v277_v23 = vld [vmem:[#allocation8 + $0x48] sm:$0xff]  ;;  %v253_v24 = vld [vmem:[#allocation7 + $0x10] sm:$0xff] }
  0x35   :  { %189 = vmatpush.msra.mxu0 %v123_v50  ;;  %313 = vmatpush.msra.mxu3 %v257_v12  ;;  %v272_v25 = vld [vmem:[#allocation8 + $0x20] sm:$0xff]  ;;  %v275_v26 = vld [vmem:[#allocation8 + $0x38] sm:$0xff]  ;;  %v252_v27 = vld [vmem:[#allocation7 + $0x8] sm:$0xff] }
  0x36   :  { %235 = vmatpush.msra.mxu2 %v140_v52  ;;  %215 = vmatpush.msra.mxu1 %v139_v53  ;;  %v270_v28 = vld [vmem:[#allocation8 + $0x10] sm:$0xff]  ;;  %v273_v29 = vld [vmem:[#allocation8 + $0x28] sm:$0xff]  ;;  %v251_v30 = vld [vmem:[#allocation7] sm:$0xff] }
  0x37   :  { %236 = vmatmul.f32.vlgmr.msra.gmra.mxu2 %v701_v54  ;;  %216 = vmatmul.f32.vlgmr.msra.gmra.mxu1 %v701_v54  ;;  %v268_v31 = vld [vmem:[#allocation8] sm:$0xff]  ;;  %v271_v32 = vld [vmem:[#allocation8 + $0x18] sm:$0xff]  ;;  %v269_v33 = vld [vmem:[#allocation8 + $0x8] sm:$0xff] }
  0x38   :  { %190 = vmatpush.msra.mxu0 %v122_v55  ;;  %349 = vmatpush.msrb.mxu1 %v299_v56  ;;  %v395_v34 = vld [vmem:[#allocation10 + $0x78] sm:$0xff]  ;;  %v394_v35 = vld [vmem:[#allocation10 + $0x70] sm:$0xff]  ;;  %v393_v36 = vld [vmem:[#allocation10 + $0x68] sm:$0xff] }
  0x39   :  { %191 = vmatmul.f32.vlgmr.msra.gmra.mxu0 %v120_v57  ;;  %314 = vmatpush.msra.mxu3 %v256_v15  ;;  %v392_v37 = vld [vmem:[#allocation10 + $0x60] sm:$0xff]  ;;  %v391_v38 = vld [vmem:[#allocation10 + $0x58] sm:$0xff]  ;;  %v390_v39 = vld [vmem:[#allocation10 + $0x50] sm:$0xff] }
  0x3a   :  { %329 = vmatpush.msrb.mxu0 %v298_v59  ;;  %350 = vmatpush.msrb.mxu1 %v297_v60  ;;  %v171_v40 = vld [vmem:[%s733_s5] sm:$0x3]  ;;  %v389_v41 = vld [vmem:[#allocation10 + $0x48] sm:$0xff]  ;;  %v387_v60 = vld [vmem:[#allocation10 + $0x38] sm:$0xff] }
  0x3b   :  { %315 = vmatpush.msra.mxu3 %v255_v18  ;;  %400 = vmatpush.msrb.mxu2 %v395_v34  ;;  %v196_v42 = vperm.slane %v171_v40, 0  ;;  %v388_v43 = vld [vmem:[#allocation10 + $0x40] sm:$0xff]  ;;  %v197_v49 = vperm.slane %v171_v40, 1 }
  0x3c   :  { %330 = vmatpush.msrb.mxu0 %v296_v61  ;;  %351 = vmatpush.msrb.mxu1 %v295_v62  ;;  %v453_v46 = vld [vmem:[%s731_s3] ss:$0 sm:$0xff]  ;;  %v386_v61 = vld [vmem:[#allocation10 + $0x30] sm:$0xff]  ;;  %v385_v62 = vld [vmem:[#allocation10 + $0x28] sm:$0xff] }
  0x3d   :  { %316 = vmatpush.msra.mxu3 %v254_v21  ;;  %401 = vmatpush.msrb.mxu2 %v394_v35 }
  0x3e   :  { %331 = vmatpush.msrb.mxu0 %v294_v63  ;;  %352 = vmatpush.msrb.mxu1 %v293_v0  ;;  %v384_v63 = vld [vmem:[#allocation10 + $0x20] sm:$0xff]  ;;  %v383_v0 = vld [vmem:[#allocation10 + $0x18] sm:$0xff] }
  0x3f   :  { %317 = vmatpush.msra.mxu3 %v253_v24  ;;  %402 = vmatpush.msrb.mxu2 %v393_v36 }
  0x40   :  { %332 = vmatpush.msrb.mxu0 %v292_v1  ;;  %353 = vmatpush.msrb.mxu1 %v291_v2  ;;  %v382_v1 = vld [vmem:[#allocation10 + $0x10] sm:$0xff]  ;;  %v381_v2 = vld [vmem:[#allocation10 + $0x8] sm:$0xff] }
  0x41   :  { %318 = vmatpush.msra.mxu3 %v252_v27  ;;  %403 = vmatpush.msrb.mxu2 %v392_v37 }
  0x42   :  { %333 = vmatpush.msrb.mxu0 %v290_v3  ;;  %354 = vmatpush.msrb.mxu1 %v289_v4  ;;  %v380_v3 = vld [vmem:[#allocation10] sm:$0xff] }
  0x43   :  { %319 = vmatpush.msra.mxu3 %v251_v30  ;;  %404 = vmatpush.msrb.mxu2 %v391_v38  ;;  %v300_v4 = vld [vmem:[%s737_s9] sm:$0x3] }
  0x44   :  { %334 = vmatpush.msrb.mxu0 %v288_v5  ;;  %355 = vmatpush.msrb.mxu1 %v287_v6  ;;  %v325_v5 = vperm.slane %v300_v4, 0 }
  0x45   :  { %405 = vmatpush.msrb.mxu2 %v390_v39 }
  0x46   :  { %335 = vmatpush.msrb.mxu0 %v286_v7  ;;  %356 = vmatpush.msrb.mxu1 %v285_v11  ;;  %v326_v7 = vperm.slane %v300_v4, 1  ;;  %v454_v11 = vld [vmem:[%s735_s7] ss:$0 sm:$0xff]  ;;  %s617_s7 = smov [#allocation11]  }
  0x47   :  { %406 = vmatpush.msrb.mxu2 %v389_v41  ;;  %s429_s4 = sshll.u32 %s617_s7, 4  ;;  %s430_s4 = int_to_ptr.vmem [resolvable:$true] %s429_s4 }
  0x48   :  { %336 = vmatpush.msrb.mxu0 %v284_v8  ;;  %357 = vmatpush.msrb.mxu1 %v283_v14 }
  0x49   :  { %407 = vmatpush.msrb.mxu2 %v388_v43 }
  0x4a   :  { %337 = vmatpush.msrb.mxu0 %v282_v10  ;;  %358 = vmatpush.msrb.mxu1 %v281_v17 }
  0x4b   :  { %408 = vmatpush.msrb.mxu2 %v387_v60 }
  0x4c   :  { %338 = vmatpush.msrb.mxu0 %v280_v13  ;;  %359 = vmatpush.msrb.mxu1 %v279_v20 }
  0x4d   :  { %409 = vmatpush.msrb.mxu2 %v386_v61 }
  0x4e   :  { %339 = vmatpush.msrb.mxu0 %v278_v16  ;;  %360 = vmatpush.msrb.mxu1 %v277_v23 }
  0x4f   :  { %410 = vmatpush.msrb.mxu2 %v385_v62 }
  0x50   :  { %340 = vmatpush.msrb.mxu0 %v276_v19  ;;  %361 = vmatpush.msrb.mxu1 %v275_v26 }
  0x51   :  { %411 = vmatpush.msrb.mxu2 %v384_v63 }
  0x52   :  { %341 = vmatpush.msrb.mxu0 %v274_v22  ;;  %362 = vmatpush.msrb.mxu1 %v273_v29  ;;  %v455_v22 = vld [vmem:[%s739_s11] ss:$0 sm:$0xff] }
  0x53   :  { %412 = vmatpush.msrb.mxu2 %v383_v0 }
  0x54   :  { %342 = vmatpush.msrb.mxu0 %v272_v25  ;;  %363 = vmatpush.msrb.mxu1 %v271_v32 }
  0x55   :  { %413 = vmatpush.msrb.mxu2 %v382_v1 }
  0x56   :  { %343 = vmatpush.msrb.mxu0 %v270_v28  ;;  %364 = vmatpush.msrb.mxu1 %v269_v33 }
  0x57   :  { %365 = vmatmul.f32.vlgmr.msrb.gmra.mxu1 %v701_v54  ;;  %414 = vmatpush.msrb.mxu2 %v381_v2 }
  0x58   :  { %344 = vmatpush.msrb.mxu0 %v268_v31 }
  0x59   :  { %345 = vmatmul.f32.vlgmr.msrb.gmra.mxu0 %v701_v54  ;;  %415 = vmatpush.msrb.mxu2 %v380_v3 }
  0xb4   :  { %v217_v44 = vpop.f32.mrf.mxu1 }
  0xb5   :  { %v218_v45 = vadd.f32 %v217_v44, %v196_v42 }
  0xb6   :  { %v192_v48 = vpop.f32.mrf.mxu0 }
  0xb7   :  { %v242_v47 = vmul.f32 0.01, %v218_v45  ;;  %vm240_vm0 = vcmp.gt.f32.partialorder %v218_v45, 0.0  ;;  %v193_v50 = vadd.f32 %v453_v46, %v192_v48 }
  0xb9   :  { %v244_v52 = vsel %vm240_vm0, %v218_v45, %v242_v47 }
  0xba   :  { %v237_v51 = vpop.f32.mrf.mxu2  ;;  %v246_v55 = vmul.f32 %v244_v52, %v193_v50 }
  0xbb   :  { %v238_v53 = vadd.f32 %v237_v51, %v197_v49 }
  0xbd   :  { %vm241_vm1 = vcmp.gt.f32.partialorder %v238_v53, 0.0  ;;  %v243_v54 = vmul.f32 0.01, %v238_v53 }
  0xbf   :  { %v245_v56 = vsel %vm241_vm1, %v238_v53, %v243_v54 }
  0xc0   :  { %v247_v57 = vadd.f32 %v246_v55, %v245_v56 }
  0xc2   :  { %vm248_vm2 = vcmp.gt.f32.partialorder %v247_v57, 0.0  ;;  %v249_v58 = vmul.f32 0.01, %v247_v57 }
  0xc4   :  { %v250_v59 = vsel %vm248_vm2, %v247_v57, %v249_v58 }
  0xc5   :  { %320 = vmatmul.f32.vlgmr.msra.gmra.mxu3 %v250_v59 }
  0xd4   :  { %v366_v8 = vpop.f32.mrf.mxu1 }
  0xd5   :  { %v367_v10 = vadd.f32 %v366_v8, %v326_v7 }
  0xd6   :  { %v346_v6 = vpop.f32.mrf.mxu0 }
  0xd7   :  { %v347_v9 = vadd.f32 %v346_v6, %v325_v5  ;;  %v372_v13 = vmul.f32 0.01, %v367_v10  ;;  %vm370_vm4 = vcmp.gt.f32.partialorder %v367_v10, 0.0 }
  0xd9   :  { %v371_v12 = vmul.f32 0.01, %v347_v9  ;;  %vm369_vm3 = vcmp.gt.f32.partialorder %v347_v9, 0.0  ;;  %v374_v18 = vsel %vm370_vm4, %v367_v10, %v372_v13 }
  0xdb   :  { %v373_v16 = vsel %vm369_vm3, %v347_v9, %v371_v12 }
 0x148   :  { %v321_v14 = vpop.f32.mrf.mxu3 }
 0x149   :  { %v322_v15 = vadd.f32 %v454_v11, %v321_v14 }
 0x14b   :  { %v375_v17 = vmul.f32 %v373_v16, %v322_v15 }
 0x14d   :  { %v376_v19 = vadd.f32 %v375_v17, %v374_v18 }
 0x14f   :  { %vm377_vm5 = vcmp.gt.f32.partialorder %v376_v19, 0.0  ;;  %v378_v20 = vmul.f32 0.01, %v376_v19 }
 0x151   :  { %v379_v21 = vsel %vm377_vm5, %v376_v19, %v378_v20 }
 0x152   :  { %416 = vmatmul.f32.vlgmr.msrb.gmra.mxu2 %v379_v21 }
 0x1d5   :  { %v417_v23 = vpop.f32.mrf.mxu2 }
 0x1d6   :  { %v418_v24 = vadd.f32 %v455_v22, %v417_v23 }
 0x1d8   :  { %vm420_vm6 = vcmp.gt.f32.partialorder %v418_v24, 0.0  ;;  %v421_v25 = vmul.f32 0.01, %v418_v24 }
 0x1da   :  { %v422_v26 = vsel %vm420_vm6, %v418_v24, %v421_v25 }
 0x1db   :  { %423 = vst [vmem:[#allocation11] sm:$0xff] %v422_v26 }
 0x1dc   :  { %434 = dma.vmem_to_hbm [thread:$0]  %s430_s4, 128, %s432_s20, [#allocation4]  }
 0x1dd   :  { %606 = dma.done.wait [#allocation4], 128  }
 0x1de   :  { %607 = vsyncadd [#allocation4], 4294967168 }
 0x1df   :  { %439 = vsyncpa [#allocation3], 1 }
 0x1e0   :  { %440 = vsyncpa [#allocation6], 1 }
 0x1e1   :  { %441 = vsyncpa [#allocation9], 1 }
 0x1e2   :  { %442 = vsyncpa [#allocation4], 1 }

</bundles_post_ra>
